<compile_context>
chip_gen: v7x
topology: tpu7x:2x2x1
jax: 0.10.0
libtpu: 0.0.40
codegen_flags: <defaults>
</compile_context>

<pallas_src>
import jax
import jax.numpy as jnp
from jax import lax
from jax.experimental import pallas as pl
from jax.experimental.pallas import tpu as pltpu


def _pick_row_tile(H, W):
    """Output rows per grid step.

    Prefer a divisor TH of H with TH*W a multiple of 128 (lane-dense output
    stores) and TH*W <= 2048 (modest VMEM, good pipelining), with >1 tile when
    possible.  Fall back to the whole image (full-dim block) otherwise.
    """
    cands = [t for t in range(1, H + 1) if H % t == 0 and (t * W) % 128 == 0]
    if not cands:
        return H
    small = [t for t in cands if t * W <= 2048]
    if not small:
        return min(cands)
    multi = [t for t in small if t < H]
    return max(multi) if multi else max(small)


def _make_conv_kernel(W, TH, Cout, KW, TM):
    """ConvBlock kernel for static geometry (W, row-tile TH, Cout, KW=3*Cin)."""

    def kernel(img_ref, w_ref, b_ref, out_ref):
        # img_ref : ((H+2)*W, KW) bf16  width-unfolded padded image (per batch, resident)
        # w_ref   : (3, Cout, KW) bf16  per-kernel-row weight slabs (resident)
        # b_ref   : (Cout, 1)     f32   bias column (resident)
        # out_ref : (Cout, TM)    f32   output tile, Cout-major (NCHW-flat), lane-dense
        h = pl.program_id(1)
        row0 = h * TH                      # first output row of this tile

        acc = jnp.zeros((Cout, TM), jnp.float32)
        for dh in range(3):                # unrolled: 3 MXU matmuls, K = 3*Cin
            # Contiguous rows [row0+dh, row0+dh+TH) of the unfolded image,
            # flattened: a sublane-aligned dynamic slice (start multiple of W).
            start = pl.multiple_of((row0 + dh) * W, W)
            tap = img_ref[pl.ds(start, TM), :]            # (TM, KW) bf16
            # (Cout, KW) x (TM, KW)^T -> (Cout, TM), f32 accumulation on the MXU.
            acc = acc + lax.dot_general(
                w_ref[dh], tap,
                dimension_numbers=(((1,), (1,)), ((), ())),
                preferred_element_type=jnp.float32)

        y = acc + b_ref[...]                               # bias (f32, lane-broadcast)
        out_ref[...] = jnp.where(y > 0, y, 0.01 * y).astype(out_ref.dtype)  # LeakyReLU

    return kernel


def conv_block_forward(x_nchw, weight_oihw, bias):
    """Conv2d(Cin, Cout, k=3, s=1, p=1) + LeakyReLU(0.01), PyTorch semantics."""
    x = x_nchw.astype(jnp.float32)                  # x = x.float()
    N, Cin, H, W = x.shape
    Cout = weight_oihw.shape[0]
    KW = 3 * Cin                                    # contraction per kernel row

    TH = _pick_row_tile(H, W)                       # output rows per grid step
    TM = TH * W                                     # flattened pixels per tile

    # --- input prep (tiny, fused by XLA): NHWC, zero-pad, width-unfold, bf16 ---
    x_pad = jnp.pad(jnp.transpose(x, (0, 2, 3, 1)),
                    ((0, 0), (1, 1), (1, 1), (0, 0)))           # (N, H+2, W+2, Cin)
    # channel index of the unfolded image = dw*Cin + ci
    x_w = jnp.concatenate([x_pad[:, :, dw:dw + W, :] for dw in range(3)],
                          axis=-1)                               # (N, H+2, W, 3*Cin)
    img = x_w.astype(jnp.bfloat16).reshape(N, (H + 2) * W, KW)

    # --- weight: OIHW -> (dh, dw, ci, co) -> (3, KW, Cout) -> (3, Cout, KW) ---
    w = jnp.transpose(weight_oihw.astype(jnp.float32), (2, 3, 1, 0))
    w = w.reshape(3, KW, Cout)
    w_t = jnp.transpose(w, (0, 2, 1)).astype(jnp.bfloat16)       # (3, Cout, KW)
    b_col = bias.astype(jnp.float32).reshape(Cout, 1)

    kernel = _make_conv_kernel(W, TH, Cout, KW, TM)

    out_flat = pl.pallas_call(
        kernel,
        out_shape=jax.ShapeDtypeStruct((N, Cout, H * W), jnp.float32),
        grid_spec=pltpu.PrefetchScalarGridSpec(
            num_scalar_prefetch=0,
            grid=(N, H // TH),
            in_specs=[
                # Whole unfolded image per batch; constant along the row-tile axis
                # => resident in VMEM, re-DMAed only when the batch index changes.
                pl.BlockSpec((None, (H + 2) * W, KW), lambda b, h: (b, 0, 0)),
                pl.BlockSpec((3, Cout, KW), lambda b, h: (0, 0, 0)),   # resident weight
                pl.BlockSpec((Cout, 1), lambda b, h: (0, 0)),          # resident bias
            ],
            # Output streamed NCHW-flat: lane-dense (Cout, TM) tiles.
            out_specs=pl.BlockSpec((None, Cout, TM), lambda b, h: (b, 0, h)),
        ),
        compiler_params=pltpu.CompilerParams(
            dimension_semantics=("parallel", "parallel")),
    )(img, w_t, b_col)

    # Layout-free reshape back to NCHW (no HBM transpose pass).
    return out_flat.reshape(N, Cout, H, W)


def _reference(x_nchw, weight_oihw, bias):
    x = x_nchw.astype(jnp.float32)
    y = lax.conv_general_dilated(
        x, weight_oihw.astype(jnp.float32),
        window_strides=(1, 1), padding=((1, 1), (1, 1)),
        dimension_numbers=("NCHW", "OIHW", "NCHW"))
    y = y + bias.reshape(1, -1, 1, 1)
    return jnp.where(y > 0, y, 0.01 * y)


if __name__ == "__main__":
    key = jax.random.PRNGKey(0)
    k_x, k_w, k_b = jax.random.split(key, 3)

    N, Cin, H, W = 2, 4, 16, 16
    Cout = 256  # module default out_channels

    x = jax.random.normal(k_x, (N, Cin, H, W), dtype=jnp.float32)
    # deterministic synthetic parameters (PyTorch-like small uniform init)
    fan_in = Cin * 3 * 3
    bound = 1.0 / jnp.sqrt(fan_in)
    weight = jax.random.uniform(k_w, (Cout, Cin, 3, 3),
                                minval=-bound, maxval=bound, dtype=jnp.float32)
    bias = jax.random.uniform(k_b, (Cout,),
                              minval=-bound, maxval=bound, dtype=jnp.float32)

    conv_block = jax.jit(conv_block_forward)
    out = jax.block_until_ready(conv_block(x, weight, bias))

    ref = jax.block_until_ready(_reference(x, weight, bias))
    assert out.shape == (N, Cout, H, W)
    # bf16 matmul inputs (f32 accumulation) => slightly looser tolerance than f32.
    assert jnp.allclose(out, ref, atol=3e-2, rtol=3e-2)

    print("KERNEL_OK")
</pallas_src>

<mosaic_0001>
module attributes {stable_mosaic.version = 11 : i64} {
  func.func @kernel(%arg0: i32, %arg1: i32, %arg2: memref<1x288x12xbf16, #tpu.memory_space<vmem>>, %arg3: memref<3x256x12xbf16, #tpu.memory_space<vmem>>, %arg4: memref<256x1xf32, #tpu.memory_space<vmem>>, %arg5: memref<1x256x128xf32, #tpu.memory_space<vmem>>) attributes {dimension_semantics = [#tpu.dimension_semantics<parallel>, #tpu.dimension_semantics<parallel>], iteration_bounds = array<i64: 2, 2>, scalar_prefetch = 0 : i64, scratch_operands = 0 : i64, tpu.core_type = #tpu.core_type<tc>, window_params = [{transform_indices = @transform_0, window_bounds = array<i64: 1, 288, 12>}, {pipeline_mode = #tpu.pipeline_mode<synchronous>, transform_indices = @transform_1, window_bounds = array<i64: 3, 256, 12>}, {pipeline_mode = #tpu.pipeline_mode<synchronous>, transform_indices = @transform_2, window_bounds = array<i64: 256, 1>}, {transform_indices = @transform_3, window_bounds = array<i64: 1, 256, 128>}]} {
    %c8_i32 = arith.constant 8 : i32
    %0 = arith.muli %arg1, %c8_i32 : i32
    %cst = arith.constant 0.000000e+00 : f32
    %1 = vector.broadcast %cst : f32 to vector<256x128xf32>
    %c0_i32 = arith.constant 0 : i32
    %2 = arith.addi %0, %c0_i32 : i32
    %c16_i32 = arith.constant 16 : i32
    %3 = arith.muli %2, %c16_i32 : i32
    %4 = tpu.assume_multiple %3, 16 : i32
    %c0 = arith.constant 0 : index
    %5 = arith.index_cast %4 : i32 to index
    %c0_0 = arith.constant 0 : index
    %6 = vector.load %arg2[%c0, %5, %c0_0] : memref<1x288x12xbf16, #tpu.memory_space<vmem>>, vector<1x128x12xbf16>
    %7 = vector.shape_cast %6 : vector<1x128x12xbf16> to vector<128x12xbf16>
    %c0_1 = arith.constant 0 : index
    %c0_2 = arith.constant 0 : index
    %c0_3 = arith.constant 0 : index
    %8 = vector.load %arg3[%c0_1, %c0_2, %c0_3] : memref<3x256x12xbf16, #tpu.memory_space<vmem>>, vector<1x256x12xbf16>
    %9 = vector.shape_cast %8 : vector<1x256x12xbf16> to vector<256x12xbf16>
    %cst_4 = arith.constant dense<0.000000e+00> : vector<256x128xf32>
    %10 = tpu.matmul %9, %7, %cst_4 {dimension_numbers = #tpu.dot_dimension_numbers<[1], [1], [0], [0], [0, 0, 1, 0], [], []>} : vector<256x12xbf16>, vector<128x12xbf16>, vector<256x128xf32> -> vector<256x128xf32>
    %11 = arith.addf %1, %10 : vector<256x128xf32>
    %c1_i32 = arith.constant 1 : i32
    %12 = arith.addi %0, %c1_i32 : i32
    %c16_i32_5 = arith.constant 16 : i32
    %13 = arith.muli %12, %c16_i32_5 : i32
    %14 = tpu.assume_multiple %13, 16 : i32
    %c0_6 = arith.constant 0 : index
    %15 = arith.index_cast %14 : i32 to index
    %c0_7 = arith.constant 0 : index
    %16 = vector.load %arg2[%c0_6, %15, %c0_7] : memref<1x288x12xbf16, #tpu.memory_space<vmem>>, vector<1x128x12xbf16>
    %17 = vector.shape_cast %16 : vector<1x128x12xbf16> to vector<128x12xbf16>
    %c1 = arith.constant 1 : index
    %c0_8 = arith.constant 0 : index
    %c0_9 = arith.constant 0 : index
    %18 = vector.load %arg3[%c1, %c0_8, %c0_9] : memref<3x256x12xbf16, #tpu.memory_space<vmem>>, vector<1x256x12xbf16>
    %19 = vector.shape_cast %18 : vector<1x256x12xbf16> to vector<256x12xbf16>
    %cst_10 = arith.constant dense<0.000000e+00> : vector<256x128xf32>
    %20 = tpu.matmul %19, %17, %cst_10 {dimension_numbers = #tpu.dot_dimension_numbers<[1], [1], [0], [0], [0, 0, 1, 0], [], []>} : vector<256x12xbf16>, vector<128x12xbf16>, vector<256x128xf32> -> vector<256x128xf32>
    %21 = arith.addf %11, %20 : vector<256x128xf32>
    %c2_i32 = arith.constant 2 : i32
    %22 = arith.addi %0, %c2_i32 : i32
    %c16_i32_11 = arith.constant 16 : i32
    %23 = arith.muli %22, %c16_i32_11 : i32
    %24 = tpu.assume_multiple %23, 16 : i32
    %c0_12 = arith.constant 0 : index
    %25 = arith.index_cast %24 : i32 to index
    %c0_13 = arith.constant 0 : index
    %26 = vector.load %arg2[%c0_12, %25, %c0_13] : memref<1x288x12xbf16, #tpu.memory_space<vmem>>, vector<1x128x12xbf16>
    %27 = vector.shape_cast %26 : vector<1x128x12xbf16> to vector<128x12xbf16>
    %c2 = arith.constant 2 : index
    %c0_14 = arith.constant 0 : index
    %c0_15 = arith.constant 0 : index
    %28 = vector.load %arg3[%c2, %c0_14, %c0_15] : memref<3x256x12xbf16, #tpu.memory_space<vmem>>, vector<1x256x12xbf16>
    %29 = vector.shape_cast %28 : vector<1x256x12xbf16> to vector<256x12xbf16>
    %cst_16 = arith.constant dense<0.000000e+00> : vector<256x128xf32>
    %30 = tpu.matmul %29, %27, %cst_16 {dimension_numbers = #tpu.dot_dimension_numbers<[1], [1], [0], [0], [0, 0, 1, 0], [], []>} : vector<256x12xbf16>, vector<128x12xbf16>, vector<256x128xf32> -> vector<256x128xf32>
    %31 = arith.addf %21, %30 : vector<256x128xf32>
    %c0_17 = arith.constant 0 : index
    %c0_18 = arith.constant 0 : index
    %32 = vector.load %arg4[%c0_17, %c0_18] : memref<256x1xf32, #tpu.memory_space<vmem>>, vector<256x1xf32>
    %33 = vector.broadcast %32 : vector<256x1xf32> to vector<256x128xf32>
    %34 = arith.addf %31, %33 : vector<256x128xf32>
    %cst_19 = arith.constant 0.000000e+00 : f32
    %35 = vector.broadcast %cst_19 : f32 to vector<256x128xf32>
    %36 = arith.cmpf ogt, %34, %35 : vector<256x128xf32>
    %cst_20 = arith.constant 0.00999999977 : f32
    %37 = vector.broadcast %cst_20 : f32 to vector<256x128xf32>
    %38 = arith.mulf %37, %34 : vector<256x128xf32>
    %39 = arith.select %36, %34, %38 : vector<256x128xi1>, vector<256x128xf32>
    %c0_21 = arith.constant 0 : index
    %c0_22 = arith.constant 0 : index
    %c0_23 = arith.constant 0 : index
    %40 = vector.load %arg5[%c0_21, %c0_22, %c0_23] : memref<1x256x128xf32, #tpu.memory_space<vmem>>, vector<1x256x128xf32>
    %41 = vector.shape_cast %40 : vector<1x256x128xf32> to vector<256x128xf32>
    %42 = vector.shape_cast %39 : vector<256x128xf32> to vector<1x256x128xf32>
    tpu.vector_store %arg5[%c0_21, %c0_22, %c0_23], %42 {strides = array<i32>} : memref<1x256x128xf32, #tpu.memory_space<vmem>>, vector<1x256x128xf32>,
    return
  }
  func.func @transform_0(%arg0: i32, %arg1: i32) -> (i32, i32, i32) {
    %c0_i32 = arith.constant 0 : i32
    %c0_i32_0 = arith.constant 0 : i32
    %c0_i32_1 = arith.constant 0 : i32
    return %arg0, %c0_i32, %c0_i32_0 : i32, i32, i32
  }
  func.func @transform_1(%arg0: i32, %arg1: i32) -> (i32, i32, i32) {
    %c0_i32 = arith.constant 0 : i32
    %c0_i32_0 = arith.constant 0 : i32
    %c0_i32_1 = arith.constant 0 : i32
    %c0_i32_2 = arith.constant 0 : i32
    return %c0_i32, %c0_i32_0, %c0_i32_1 : i32, i32, i32
  }
  func.func @transform_2(%arg0: i32, %arg1: i32) -> (i32, i32) {
    %c0_i32 = arith.constant 0 : i32
    %c0_i32_0 = arith.constant 0 : i32
    %c0_i32_1 = arith.constant 0 : i32
    return %c0_i32, %c0_i32_0 : i32, i32
  }
  func.func @transform_3(%arg0: i32, %arg1: i32) -> (i32, i32, i32) {
    %c0_i32 = arith.constant 0 : i32
    %c0_i32_0 = arith.constant 0 : i32
    return %arg0, %c0_i32, %arg1 : i32, i32, i32
  }
}

</mosaic_0001>

<bundles_post_ra>
// kernel: conv_block_forward.1
= control target key start
LH: loop header
LB: loop body
LE: loop exit
PB: predicated region body
PF: predicated region fallthrough
CT: control target
= control target key end

     0   :  { %s2771_s12 = smov 0   ;;  %s2773_s13 = smov 0   ;;  %s3509_s0 = inlined_call_operand.vmem [shape: bf16[2,288,12], index: 0, kind: input, shape index: {}]   ;;  %s3510_s1 = inlined_call_operand.vmem [shape: bf16[3,256,12], index: 1, kind: input, shape index: {}]   ;;  %s3511_s2 = inlined_call_operand.vmem [shape: f32[256,1], index: 2, kind: input, shape index: {}]   ;;  %s3512_s3 = inlined_call_operand.vmem [shape: f32[2,256,256], index: 3, kind: output, shape index: {}]  }
   0x1   :  { %s2775_s14 = smov 0   ;;  %s2777_s15 = smov 0  }
   0x2   :  { %s2779_s16 = smov 0   ;;  %s2781_s17 = smov 0  }
   0x3   :  { %s2783_s18 = smov 0  }
   0x4 LB: > { %s22_s19 = sadd.s32 1, %s2740_s16  ;;  %s25_s20 = sadd.s32 1, %s2744_s17  ;;  %s2748_s18 = sphi %s2783_s18, %s13_s18   ;;  %s2744_s17 = sphi %s2781_s17, %s3535_s17   ;;  %s2740_s16 = sphi %s2779_s16, %s3534_s16   ;;  %s2736_s15 = sphi %s2777_s15, %s3533_s15   ;;  %s2732_s14 = sphi %s2775_s14, %s3532_s14   ;;  %s2728_s13 = sphi %s2773_s13, %s3531_s13   ;;  %s2724_s12 = sphi %s2771_s12, %s3530_s12  }
   0x5   : > { %p23_p0 = scmp.ge.s32.totalorder %s22_s19, 2  ;;  %s2025_s21 = sadd.s32 4294967295, %s2748_s18  }
   0x6   : > { %p112_p1 = scmp.ne.s32.totalorder %s2728_s13, %s2724_s12  ;;  %p113_p2 = scmp.eq.s32.totalorder %s2025_s21, 3 }
   0x7   : > { %s3537_s19 = smov (%p23_p0, %s22_s19), 0  ;;  %s3539_s20 = smov (!%p23_p0, %s25_s20), %s2744_s17 }
   0x8   : > { %s98_s22 = ssub.s32 %s2740_s16, %s3537_s19  ;;  %p27_p3 = scmp.ge.s32.totalorder %s3539_s20, 2 }
   0x9   : > { %p2029_p4 = scmp.ge.s32.totalorder %s2748_s18, 1  ;;  %p2817_p5 = por %p113_p2, %p112_p1 }
   0xa   : > { %p151_p6 = scmp.lt.s32.totalorder %s2748_s18, 5  ;;  %s3541_s20 = smov (%p27_p3, %s3539_s20), 0 }
   0xb   : > { %s97_s24 = ssub.s32 %s2744_s17, %s3541_s20  ;;  %s102_s26 = sadd.s32 1, %s2728_s13 }
   0xc   : > { %p152_p7 = pnand %p2029_p4, %p151_p6  ;;  %s99_s25 = sor.u32 %s98_s22, %s97_s24 }
   0xd   : > { %p100_p8 = scmp.eq.s32.totalorder %s99_s25, 0 }
   0xe   : > { %155 = sbr.rel (%p152_p7) target bundleno = 424 (0x1a8), region = 32 }
   0xf   : > { %s2828_s27 = scalar_select %p100_p8, %s2728_s13, %s102_s26  }
  0x15   : > { %p174_p9 = scmp.lt.s32.totalorder %s2736_s15, 1  ;;  %s2832_s28 = sshll.u32 %s2732_s14, 7  ;;  %v2638_v0 = vld [vmem:[%s3510_s1 + $0x80] sm:$0xff]   ;;  %vm409_vm0 = vcmask 97280   ;;  %v2750_v3 = vmov 0   ;;  %v1438_v33 = vld [vmem:[%s3511_s2 + $0x10] sm:$0xff] }
  0x16   : > { %s2229_s4 = sadd.s32 16, %s2832_s28  ;;  %2322 = vmatprep.mubr.msk.bf16.mxu1 %vm409_vm0, %v2638_v0  ;;  %v2639_v1 = vld [vmem:[%s3510_s1] sm:$0xff]   ;;  %s182_s11 = sshra.s32 %s2832_s28, 3  ;;  %2621 = vset.pattern.permute.xlu1 %v2750_v3  ;;  %v1439_v35 = vld [vmem:[%s3511_s2 + $0x18] sm:$0xff]  ;;  %v1437_v36 = vld [vmem:[%s3511_s2 + $0x8] sm:$0xff] }
  0x17   : > { %s175_s5 = scalar_select %p174_p9, %s2736_s15, 1  ;;  %2370 = vmatprep.mubr.msk.bf16.mxu0 %vm409_vm0, %v2639_v1  ;;  %2620 = vset.pattern.permute.xlu0 %v2750_v3  ;;  %v1436_v34 = vld [vmem:[%s3511_s2] sm:$0xff]  ;;  %v1441_v37 = vld [vmem:[%s3511_s2 + $0x28] sm:$0xff]  ;;  %v1443_v42 = vld [vmem:[%s3511_s2 + $0x38] sm:$0xff] }
  0x18   : > { %s236_s8 = sshra.s32 %s2229_s4, 3  ;;  %s2034_s25 = sshll.u32 %s182_s11, 2  ;;  %1480 = vperm.xlu1 %2621, %v1438_v33   ;;  %1470 = vperm.xlu0 %2620, %v1436_v34   ;;  %v1440_v38 = vld [vmem:[%s3511_s2 + $0x20] sm:$0xff]  ;;  %v1442_v43 = vld [vmem:[%s3511_s2 + $0x30] sm:$0xff]  ;;  %v2640_v44 = vld [vmem:[%s3510_s1 + $0x88] sm:$0xff]  }
  0x19   : > { %s2562_s9 = smul.u32 144, %s175_s5  ;;  %s2036_s10 = sshll.u32 %s236_s8, 2  ;;  %v2641_v45 = vld [vmem:[%s3510_s1 + $0x8] sm:$0xff]   ;;  %v2643_v48 = vld [vmem:[%s3510_s1 + $0x90] sm:$0xff]   ;;  %v1444_v51 = vld [vmem:[%s3511_s2 + $0x40] sm:$0xff] }
  0x1a   : > { %s2231_s30 = sadd.s32 32, %s2832_s28  ;;  %v1445_v46 = vld [vmem:[%s3511_s2 + $0x48] sm:$0xff]  ;;  %v2644_v49 = vld [vmem:[%s3510_s1 + $0x10] sm:$0xff]   ;;  %v1447_v52 = vld [vmem:[%s3511_s2 + $0x58] sm:$0xff]  ;;  %s2224_s11 = sshll.u32 (%p2817_p5), %s2736_s15, 6 }
  0x1b   : > { %s2848_s24 = scalar_lea.vmem %s3509_s0, %s2562_s9  ;;  %s998_s4 = sshra.s32 %s2231_s30, 3  ;;  %v2645_v53 = vld [vmem:[%s3510_s1 + $0x98] sm:$0xff]   ;;  %v1446_v55 = vld [vmem:[%s3511_s2 + $0x50] sm:$0xff]  ;;  %v2648_v57 = vld [vmem:[%s3510_s1 + $0xa0] sm:$0xff]  }
  0x1c   : > { %s2851_s26 = scalar_lea.vmem %s2848_s24, %s2036_s10  ;;  %s2855_s29 = scalar_lea.vmem %s2848_s24, %s2034_s25  ;;  %1485 = vperm.xlu1 %2621, %v1439_v35   ;;  %1475 = vperm.xlu0 %2620, %v1437_v36   ;;  %v2646_v54 = vld [vmem:[%s3510_s1 + $0x18] sm:$0xff]   ;;  %v2649_v58 = vld [vmem:[%s3510_s1 + $0x20] sm:$0xff]   ;;  %v1449_v60 = vld [vmem:[%s3511_s2 + $0x68] sm:$0xff] }
  0x1d   : > { %v2622_v2 = vld [vmem:[%s2851_s26] sm:$0xff]   ;;  %v2624_v6 = vld [vmem:[%s2851_s26 + $0x8] sm:$0xff]   ;;  %v2626_v10 = vld [vmem:[%s2851_s26 + $0x10] sm:$0xff]   ;;  %s2150_s5 = sshll.u32 %s998_s4, 2  ;;  %s171_s9 = sand.u32 1, %s2724_s12  }
  0x1e   : > { %v2623_v4 = vld [vmem:[%s2855_s29] sm:$0xff]   ;;  %2530 = vmatprep.subr.msk.bf16.mxu1 %vm409_vm0, %v2622_v2  ;;  %v459_v5 = vsel %vm409_vm0, %v2622_v2, 0  ;;  %v2625_v8 = vld [vmem:[%s2855_s29 + $0x8] sm:$0xff]   ;;  %v462_v9 = vsel %vm409_vm0, %v2624_v6, 0  ;;  %v2627_v12 = vld [vmem:[%s2855_s29 + $0x10] sm:$0xff]   ;;  %s2874_s28 = scalar_lea.vmem %s2848_s24, %s2150_s5  ;;  %v465_v13 = vsel %vm409_vm0, %v2626_v10, 0  ;;  %s1796_s23 = sadd.s32 (%p2817_p5), %s2732_s14, %s2224_s11 }
  0x1f   : > { %2538 = vmatprep.subr.msk.bf16.mxu0 %vm409_vm0, %v2623_v4  ;;  %2307 = vmatpush3.bf16.xpose.msra.mxu1 %v459_v5  ;;  %v812_v7 = vsel %vm409_vm0, %v2623_v4, 0  ;;  %v815_v11 = vsel %vm409_vm0, %v2625_v8, 0  ;;  %v2628_v14 = vld [vmem:[%s2851_s26 + $0x18] sm:$0xff]   ;;  %v818_v15 = vsel %vm409_vm0, %v2627_v12, 0  ;;  %v2630_v18 = vld [vmem:[%s2851_s26 + $0x20] sm:$0xff]   ;;  %v2632_v22 = vld [vmem:[%s2851_s26 + $0x28] sm:$0xff]  }
  0x20   : > { %2355 = vmatpush3.bf16.xpose.msra.mxu0 %v812_v7  ;;  %2531 = vmatprep.subr.msk.bf16.mxu1 %vm409_vm0, %v2624_v6  ;;  %v2629_v16 = vld [vmem:[%s2855_s29 + $0x18] sm:$0xff]   ;;  %v468_v17 = vsel %vm409_vm0, %v2628_v14, 0  ;;  %v2631_v20 = vld [vmem:[%s2855_s29 + $0x20] sm:$0xff]   ;;  %v471_v21 = vsel %vm409_vm0, %v2630_v18, 0  ;;  %v2633_v24 = vld [vmem:[%s2855_s29 + $0x28] sm:$0xff]   ;;  %v474_v25 = vsel %vm409_vm0, %v2632_v22, 0 }
  0x21   : > { %2539 = vmatprep.subr.msk.bf16.mxu0 %vm409_vm0, %v2625_v8  ;;  %v821_v19 = vsel %vm409_vm0, %v2629_v16, 0  ;;  %v824_v23 = vsel %vm409_vm0, %v2631_v20, 0  ;;  %v2634_v26 = vld [vmem:[%s2851_s26 + $0x30] sm:$0xff]   ;;  %v827_v27 = vsel %vm409_vm0, %v2633_v24, 0  ;;  %v2636_v30 = vld [vmem:[%s2851_s26 + $0x38] sm:$0xff]   ;;  %v2642_v40 = vld [vmem:[%s2874_s28] sm:$0xff]   ;;  %1495 = vperm.xlu1 %2621, %v1441_v37  }
  0x22   : > { %v2635_v28 = vld [vmem:[%s2855_s29 + $0x30] sm:$0xff]   ;;  %v477_v29 = vsel %vm409_vm0, %v2634_v26, 0  ;;  %v2637_v32 = vld [vmem:[%s2855_s29 + $0x38] sm:$0xff]   ;;  %v480_v39 = vsel %vm409_vm0, %v2636_v30, 0  ;;  %1490 = vperm.xlu0 %2620, %v1440_v38   ;;  %v1220_v47 = vsel %vm409_vm0, %v2642_v40, 0  ;;  %v2647_v50 = vld [vmem:[%s2874_s28 + $0x8] sm:$0xff]  }
  0x23   : > { %v830_v31 = vsel %vm409_vm0, %v2635_v28, 0  ;;  %v833_v41 = vsel %vm409_vm0, %v2637_v32, 0  ;;  %v1223_v56 = vsel %vm409_vm0, %v2647_v50, 0  ;;  %v2652_v59 = vld [vmem:[%s2874_s28 + $0x10] sm:$0xff]   ;;  %v1448_v61 = vld [vmem:[%s3511_s2 + $0x60] sm:$0xff]  ;;  %v2650_v62 = vld [vmem:[%s3510_s1 + $0xa8] sm:$0xff]  }
  0x24   : > { %v2651_v63 = vld [vmem:[%s3510_s1 + $0x28] sm:$0xff]   ;;  %v1451_v0 = vld [vmem:[%s3511_s2 + $0x78] sm:$0xff]  ;;  %v1226_v1 = vsel %vm409_vm0, %v2652_v59, 0  ;;  %v2653_v2 = vld [vmem:[%s3510_s1 + $0xb0] sm:$0xff]   ;;  %s2030_s10 = sshll.u32 %s171_s9, 8  ;;  %s2225_s21 = sshll.u32 (%p2817_p5), %s1796_s23, 3 }
  0x25   : > { %1505 = vperm.xlu1 %2621, %v1443_v42   ;;  %v2654_v3 = vld [vmem:[%s3510_s1 + $0x30] sm:$0xff]   ;;  %v2657_v4 = vld [vmem:[%s2874_s28 + $0x18] sm:$0xff]   ;;  %v1453_v6 = vld [vmem:[%s3511_s2 + $0x88] sm:$0xff]  ;;  %s3330_s12 = scalar_lea.vmem [#allocation2], %s2030_s10 }
  0x26   : > { %1500 = vperm.xlu0 %2620, %v1442_v43   ;;  %v1450_v5 = vld [vmem:[%s3511_s2 + $0x70] sm:$0xff]  ;;  %v2655_v7 = vld [vmem:[%s3510_s1 + $0xb8] sm:$0xff]   ;;  %v1460_v33 = vld [vmem:[%s3511_s2 + $0xc0] sm:$0xff] }
  0x27   : > { %2309 = vmatpush3.bf16.xpose.msra.mxu1 %v462_v9  ;;  %v2656_v8 = vld [vmem:[%s3510_s1 + $0x38] sm:$0xff]   ;;  %v1452_v9 = vld [vmem:[%s3511_s2 + $0x80] sm:$0xff]  ;;  %v2670_v34 = vld [vmem:[%s3510_s1 + $0xe8] sm:$0xff]  }
  0x28   : > { %2357 = vmatpush3.bf16.xpose.msra.mxu0 %v815_v11  ;;  %2532 = vmatprep.subr.msk.bf16.mxu1 %vm409_vm0, %v2626_v10  ;;  %v1229_v10 = vsel %vm409_vm0, %v2657_v4, 0  ;;  %v2658_v11 = vld [vmem:[%s3510_s1 + $0xc0] sm:$0xff]   ;;  %v2671_v35 = vld [vmem:[%s3510_s1 + $0x68] sm:$0xff]   ;;  %v1463_v36 = vld [vmem:[%s3511_s2 + $0xd8] sm:$0xff] }
  0x29   : > { %2540 = vmatprep.subr.msk.bf16.mxu0 %vm409_vm0, %v2627_v12  ;;  %1515 = vperm.xlu1 %2621, %v1445_v46   ;;  %v2659_v12 = vld [vmem:[%s3510_s1 + $0x40] sm:$0xff]   ;;  %v2673_v38 = vld [vmem:[%s3510_s1 + $0xf0] sm:$0xff]   ;;  %v1465_v42 = vld [vmem:[%s3511_s2 + $0xe8] sm:$0xff] }
  0x2a   : > { %1510 = vperm.xlu0 %2620, %v1444_v51   ;;  %v2675_v43 = vld [vmem:[%s3510_s1 + $0xf8] sm:$0xff]   ;;  %v2681_v51 = vld [vmem:[%s3510_s1 + $0x148] sm:$0xff]  }
  0x2d   : > { %1525 = vperm.xlu1 %2621, %v1447_v52   ;;  %v2680_v52 = vld [vmem:[%s3510_s1 + $0x108] sm:$0xff]  }
  0x2e   : > { %1520 = vperm.xlu0 %2620, %v1446_v55   ;;  %v2685_v55 = vld [vmem:[%s3510_s1 + $0x158] sm:$0xff]  }
  0x2f   : > { %2311 = vmatpush3.bf16.xpose.msra.mxu1 %v465_v13  ;;  %v2662_v13 = vld [vmem:[%s2874_s28 + $0x20] sm:$0xff]  }
  0x30   : > { %2359 = vmatpush3.bf16.xpose.msra.mxu0 %v818_v15  ;;  %2533 = vmatprep.subr.msk.bf16.mxu1 %vm409_vm0, %v2628_v14  ;;  %v1455_v14 = vld [vmem:[%s3511_s2 + $0x98] sm:$0xff]  ;;  %v1454_v15 = vld [vmem:[%s3511_s2 + $0x90] sm:$0xff] }
  0x31   : > { %2541 = vmatprep.subr.msk.bf16.mxu0 %vm409_vm0, %v2629_v16  ;;  %1535 = vperm.xlu1 %2621, %v1449_v60   ;;  %v2660_v16 = vld [vmem:[%s3510_s1 + $0xc8] sm:$0xff]  }
  0x32   : > { %1530 = vperm.xlu0 %2620, %v1448_v61   ;;  %v2688_v60 = vld [vmem:[%s3510_s1 + $0x128] sm:$0xff]   ;;  %v2691_v61 = vld [vmem:[%s3510_s1 + $0x170] sm:$0xff]  }
  0x35   : > { %1545 = vperm.xlu1 %2621, %v1451_v0   ;;  %v2692_v0 = vld [vmem:[%s3510_s1 + $0x138] sm:$0xff]  }
  0x36   : > { %1540 = vperm.xlu0 %2620, %v1450_v5  }
  0x37   : > { %2313 = vmatpush3.bf16.xpose.msra.mxu1 %v468_v17  ;;  %v2661_v17 = vld [vmem:[%s3510_s1 + $0x48] sm:$0xff]  }
  0x38   : > { %2361 = vmatpush3.bf16.xpose.msra.mxu0 %v821_v19  ;;  %2534 = vmatprep.subr.msk.bf16.mxu1 %vm409_vm0, %v2630_v18  ;;  %v1457_v18 = vld [vmem:[%s3511_s2 + $0xa8] sm:$0xff]  ;;  %v1232_v19 = vsel %vm409_vm0, %v2662_v13, 0 }
  0x39   : > { %2542 = vmatprep.subr.msk.bf16.mxu0 %vm409_vm0, %v2631_v20  ;;  %1555 = vperm.xlu1 %2621, %v1453_v6   ;;  %v2663_v20 = vld [vmem:[%s3510_s1 + $0xd0] sm:$0xff]  }
  0x3a   : > { %1550 = vperm.xlu0 %2620, %v1452_v9  }
  0x3d   : > { %1565 = vperm.xlu1 %2621, %v1455_v14  }
  0x3e   : > { %1560 = vperm.xlu0 %2620, %v1454_v15  }
  0x3f   : > { %2315 = vmatpush3.bf16.xpose.msra.mxu1 %v471_v21  ;;  %v2664_v21 = vld [vmem:[%s3510_s1 + $0x50] sm:$0xff]  }
  0x40   : > { %2363 = vmatpush3.bf16.xpose.msra.mxu0 %v824_v23  ;;  %2535 = vmatprep.subr.msk.bf16.mxu1 %vm409_vm0, %v2632_v22  ;;  %v2667_v22 = vld [vmem:[%s2874_s28 + $0x28] sm:$0xff]   ;;  %v1456_v23 = vld [vmem:[%s3511_s2 + $0xa0] sm:$0xff] }
  0x41   : > { %2543 = vmatprep.subr.msk.bf16.mxu0 %vm409_vm0, %v2633_v24  ;;  %1575 = vperm.xlu1 %2621, %v1457_v18   ;;  %v1459_v24 = vld [vmem:[%s3511_s2 + $0xb8] sm:$0xff] }
  0x42   : > { %1570 = vperm.xlu0 %2620, %v1456_v23  }
  0x45   : > { %1585 = vperm.xlu1 %2621, %v1459_v24  }
  0x47   : > { %2317 = vmatpush3.bf16.xpose.msra.mxu1 %v474_v25  ;;  %v2665_v25 = vld [vmem:[%s3510_s1 + $0xd8] sm:$0xff]  }
  0x48   : > { %2365 = vmatpush3.bf16.xpose.msra.mxu0 %v827_v27  ;;  %2536 = vmatprep.subr.msk.bf16.mxu1 %vm409_vm0, %v2634_v26  ;;  %v2666_v26 = vld [vmem:[%s3510_s1 + $0x58] sm:$0xff]   ;;  %v1458_v27 = vld [vmem:[%s3511_s2 + $0xb0] sm:$0xff] }
  0x49   : > { %2544 = vmatprep.subr.msk.bf16.mxu0 %vm409_vm0, %v2635_v28  ;;  %v1235_v28 = vsel %vm409_vm0, %v2667_v22, 0  ;;  %1580 = vperm.xlu0 %2620, %v1458_v27  }
  0x4d   : > { %1590 = vperm.xlu0 %2620, %v1460_v33  }
  0x4f   : > { %2319 = vmatpush3.bf16.xpose.msra.mxu1 %v477_v29  ;;  %v2668_v29 = vld [vmem:[%s3510_s1 + $0xe0] sm:$0xff]  }
  0x50   : > { %2367 = vmatpush3.bf16.xpose.msra.mxu0 %v830_v31  ;;  %2537 = vmatprep.subr.msk.bf16.mxu1 %vm409_vm0, %v2636_v30  ;;  %v2669_v30 = vld [vmem:[%s3510_s1 + $0x60] sm:$0xff]   ;;  %v2672_v31 = vld [vmem:[%s2874_s28 + $0x30] sm:$0xff]  }
  0x51   : > { %2545 = vmatprep.subr.msk.bf16.mxu0 %vm409_vm0, %v2637_v32  ;;  %v1461_v32 = vld [vmem:[%s3511_s2 + $0xc8] sm:$0xff]  ;;  %v1238_v37 = vsel %vm409_vm0, %v2672_v31, 0 }
  0x52   : > { %1595 = vperm.xlu1 %2621, %v1461_v32  }
  0x56   : > { %1605 = vperm.xlu1 %2621, %v1463_v36  }
  0x57   : > { %2321 = vmatpush3.bf16.xpose.msra.mxu1 %v480_v39  ;;  %v2674_v39 = vld [vmem:[%s3510_s1 + $0x70] sm:$0xff]  }
  0x58   : > { %2369 = vmatpush3.bf16.xpose.msra.mxu0 %v833_v41  ;;  %2547 = vmatprep.subr.msk.bf16.mxu1 %vm409_vm0, %v2642_v40  ;;  %v1462_v41 = vld [vmem:[%s3511_s2 + $0xd0] sm:$0xff] }
  0x59   : > { %2546 = vmatprep.subr.msk.bf16.mxu0 %vm409_vm0, %v2642_v40  ;;  %v2677_v40 = vld [vmem:[%s2874_s28 + $0x38] sm:$0xff]   ;;  %1600 = vperm.xlu0 %2620, %v1462_v41   ;;  %s3431_s28 = scalar_lea.vmem (%p2817_p5), %s3512_s3, %s2225_s21 }
  0x5a   : > { %1615 = vperm.xlu1 %2621, %v1465_v42   ;;  %v1241_v46 = vsel %vm409_vm0, %v2677_v40, 0 }
  0x5e   : > { %2323 = vmatmul.mubr.msk.bf16.vlgmr.msra.gmra.mrb[0].mxu1 %vm409_vm0, %v2640_v44  ;;  %v2676_v44 = vld [vmem:[%s3510_s1 + $0x78] sm:$0xff]  }
  0x5f   : > { %2371 = vmatmul.mubr.msk.bf16.vlgmr.msra.gmra.mrb[0].mxu0 %vm409_vm0, %v2641_v45  ;;  %2458 = vmatpush3.bf16.xpose.msra.mxu1 %v1220_v47  ;;  %v1464_v45 = vld [vmem:[%s3511_s2 + $0xe0] sm:$0xff] }
  0x60   : > { %2403 = vmatpush3.bf16.xpose.msra.mxu0 %v1220_v47  ;;  %2326 = vmatprep.mubr.msk.bf16.mxu1 %vm409_vm0, %v2643_v48  ;;  %v2678_v47 = vld [vmem:[%s3510_s1 + $0x100] sm:$0xff]  }
  0x61   : > { %2374 = vmatprep.mubr.msk.bf16.mxu0 %vm409_vm0, %v2644_v49  ;;  %2548 = vmatprep.subr.msk.bf16.mxu0 %vm409_vm0, %v2647_v50  ;;  %v2679_v48 = vld [vmem:[%s3510_s1 + $0x140] sm:$0xff]   ;;  %v1467_v49 = vld [vmem:[%s3511_s2 + $0xf8] sm:$0xff] }
  0x62   : > { %2549 = vmatprep.subr.msk.bf16.mxu1 %vm409_vm0, %v2647_v50  ;;  %1610 = vperm.xlu0 %2620, %v1464_v45   ;;  %v1466_v50 = vld [vmem:[%s3511_s2 + $0xf0] sm:$0xff] }
  0x63   : > { %1625 = vperm.xlu1 %2621, %v1467_v49  }
  0x66   : > { %2327 = vmatmul.mubr.msk.bf16.gmra.mrb[4].mxu1 %vm409_vm0, %v2645_v53  ;;  %1620 = vperm.xlu0 %2620, %v1466_v50   ;;  %v2683_v53 = vld [vmem:[%s3510_s1 + $0x150] sm:$0xff]  }
  0x67   : > { %2375 = vmatmul.mubr.msk.bf16.gmra.mrb[4].mxu0 %vm409_vm0, %v2646_v54  ;;  %2459 = vmatpush3.bf16.xpose.msra.mxu1 %v1223_v56  ;;  %v2682_v54 = vld [vmem:[%s3510_s1 + $0x110] sm:$0xff]  }
  0x68   : > { %2405 = vmatpush3.bf16.xpose.msra.mxu0 %v1223_v56  ;;  %2330 = vmatprep.mubr.msk.bf16.mxu1 %vm409_vm0, %v2648_v57  ;;  %v2684_v56 = vld [vmem:[%s3510_s1 + $0x118] sm:$0xff]   ;;  %v2687_v57 = vld [vmem:[%s3510_s1 + $0x160] sm:$0xff]  }
  0x69   : > { %2378 = vmatprep.mubr.msk.bf16.mxu0 %vm409_vm0, %v2649_v58  ;;  %2550 = vmatprep.subr.msk.bf16.mxu0 %vm409_vm0, %v2652_v59  ;;  %v2686_v58 = vld [vmem:[%s3510_s1 + $0x120] sm:$0xff]  }
  0x6a   : > { %2551 = vmatprep.subr.msk.bf16.mxu1 %vm409_vm0, %v2652_v59  ;;  %v2689_v59 = vld [vmem:[%s3510_s1 + $0x168] sm:$0xff]  }
  0x6e   : > { %2331 = vmatmul.mubr.msk.bf16.gmra.mrb[8].mxu1 %vm409_vm0, %v2650_v62  ;;  %v2690_v62 = vld [vmem:[%s3510_s1 + $0x130] sm:$0xff]  }
  0x6f   : > { %2379 = vmatmul.mubr.msk.bf16.gmra.mrb[8].mxu0 %vm409_vm0, %v2651_v63  ;;  %2460 = vmatpush3.bf16.xpose.msra.mxu1 %v1226_v1  ;;  %v2693_v63 = vld [vmem:[%s3510_s1 + $0x178] sm:$0xff]  }
  0x70   : > { %2407 = vmatpush3.bf16.xpose.msra.mxu0 %v1226_v1  ;;  %2334 = vmatprep.mubr.msk.bf16.mxu1 %vm409_vm0, %v2653_v2 }
  0x71   : > { %2382 = vmatprep.mubr.msk.bf16.mxu0 %vm409_vm0, %v2654_v3  ;;  %2552 = vmatprep.subr.msk.bf16.mxu0 %vm409_vm0, %v2657_v4 }
  0x72   : > { %2553 = vmatprep.subr.msk.bf16.mxu1 %vm409_vm0, %v2657_v4 }
  0x76   : > { %2335 = vmatmul.mubr.msk.bf16.gmra.mrb[12].mxu1 %vm409_vm0, %v2655_v7 }
  0x77   : > { %2383 = vmatmul.mubr.msk.bf16.gmra.mrb[12].mxu0 %vm409_vm0, %v2656_v8  ;;  %2461 = vmatpush3.bf16.xpose.msra.mxu1 %v1229_v10 }
  0x78   : > { %2409 = vmatpush3.bf16.xpose.msra.mxu0 %v1229_v10  ;;  %2338 = vmatprep.mubr.msk.bf16.mxu1 %vm409_vm0, %v2658_v11 }
  0x79   : > { %2386 = vmatprep.mubr.msk.bf16.mxu0 %vm409_vm0, %v2659_v12  ;;  %2554 = vmatprep.subr.msk.bf16.mxu0 %vm409_vm0, %v2662_v13 }
  0x7a   : > { %2555 = vmatprep.subr.msk.bf16.mxu1 %vm409_vm0, %v2662_v13 }
  0x7e   : > { %2339 = vmatmul.mubr.msk.bf16.gmra.mrb[16].mxu1 %vm409_vm0, %v2660_v16 }
  0x7f   : > { %2387 = vmatmul.mubr.msk.bf16.gmra.mrb[16].mxu0 %vm409_vm0, %v2661_v17  ;;  %2462 = vmatpush3.bf16.xpose.msra.mxu1 %v1232_v19 }
  0x80   : > { %2411 = vmatpush3.bf16.xpose.msra.mxu0 %v1232_v19  ;;  %2342 = vmatprep.mubr.msk.bf16.mxu1 %vm409_vm0, %v2663_v20 }
  0x81   : > { %2390 = vmatprep.mubr.msk.bf16.mxu0 %vm409_vm0, %v2664_v21  ;;  %2556 = vmatprep.subr.msk.bf16.mxu0 %vm409_vm0, %v2667_v22 }
  0x82   : > { %2557 = vmatprep.subr.msk.bf16.mxu1 %vm409_vm0, %v2667_v22 }
  0x86   : > { %2343 = vmatmul.mubr.msk.bf16.gmra.mrb[20].mxu1 %vm409_vm0, %v2665_v25 }
  0x87   : > { %2391 = vmatmul.mubr.msk.bf16.gmra.mrb[20].mxu0 %vm409_vm0, %v2666_v26  ;;  %2463 = vmatpush3.bf16.xpose.msra.mxu1 %v1235_v28 }
  0x88   : > { %2413 = vmatpush3.bf16.xpose.msra.mxu0 %v1235_v28  ;;  %2346 = vmatprep.mubr.msk.bf16.mxu1 %vm409_vm0, %v2668_v29 }
  0x89   : > { %2394 = vmatprep.mubr.msk.bf16.mxu0 %vm409_vm0, %v2669_v30  ;;  %2558 = vmatprep.subr.msk.bf16.mxu0 %vm409_vm0, %v2672_v31 }
  0x8a   : > { %2559 = vmatprep.subr.msk.bf16.mxu1 %vm409_vm0, %v2672_v31 }
  0x8e   : > { %2347 = vmatmul.mubr.msk.bf16.gmra.mrb[24].mxu1 %vm409_vm0, %v2670_v34 }
  0x8f   : > { %2395 = vmatmul.mubr.msk.bf16.gmra.mrb[24].mxu0 %vm409_vm0, %v2671_v35  ;;  %2464 = vmatpush3.bf16.xpose.msra.mxu1 %v1238_v37 }
  0x90   : > { %2415 = vmatpush3.bf16.xpose.msra.mxu0 %v1238_v37  ;;  %2350 = vmatprep.mubr.msk.bf16.mxu1 %vm409_vm0, %v2673_v38 }
  0x91   : > { %2398 = vmatprep.mubr.msk.bf16.mxu0 %vm409_vm0, %v2674_v39  ;;  %2560 = vmatprep.subr.msk.bf16.mxu0 %vm409_vm0, %v2677_v40 }
  0x92   : > { %2561 = vmatprep.subr.msk.bf16.mxu1 %vm409_vm0, %v2677_v40 }
  0x96   : > { %2351 = vmatmul.mubr.msk.bf16.gmra.mrb[28].mxu1 %vm409_vm0, %v2675_v43 }
  0x97   : > { %2399 = vmatmul.mubr.msk.bf16.gmra.mrb[28].mxu0 %vm409_vm0, %v2676_v44  ;;  %2465 = vmatpush3.bf16.xpose.msra.mxu1 %v1241_v46  ;;  %v3220_v1 = vpop.permute.xlu0 %1470  ;;  %v3222_v2 = vpop.permute.xlu1 %1480 }
  0x98   : > { %2417 = vmatpush3.bf16.xpose.msra.mxu0 %v1241_v46  ;;  %2418 = vmatprep.mubr.msk.bf16.mxu0 %vm409_vm0, %v2678_v47 }
  0x99   : > { %2434 = vmatprep.mubr.msk.bf16.mxu1 %vm409_vm0, %v2679_v48 }
  0x9b   : > { %v3224_v3 = vpop.permute.xlu0 %1475  ;;  %v3228_v5 = vpop.permute.xlu1 %1485 }
  0x9e   : > { %2435 = vmatmul.mubr.msk.bf16.vlgmr.msra.gmra.mrb[32].mxu1 %vm409_vm0, %v2681_v51 }
  0x9f   : > { %2419 = vmatmul.mubr.msk.bf16.vlgmr.msra.gmra.mrb[0].mxu0 %vm409_vm0, %v2680_v52  ;;  %2438 = vmatprep.mubr.msk.bf16.mxu1 %vm409_vm0, %v2683_v53 }
  0xa0   : > { %2422 = vmatprep.mubr.msk.bf16.mxu0 %vm409_vm0, %v2682_v54  ;;  %v3238_v10 = vpop.permute.xlu1 %1495 }
  0xa1   : > { %v3232_v7 = vpop.permute.xlu0 %1490 }
  0xa4   : > { %v3250_v16 = vpop.permute.xlu1 %1505 }
  0xa5   : > { %v3240_v11 = vpop.permute.xlu0 %1500 }
  0xa6   : > { %2439 = vmatmul.mubr.msk.bf16.gmra.mrb[36].mxu1 %vm409_vm0, %v2685_v55 }
  0xa7   : > { %2423 = vmatmul.mubr.msk.bf16.gmra.mrb[4].mxu0 %vm409_vm0, %v2684_v56  ;;  %2442 = vmatprep.mubr.msk.bf16.mxu1 %vm409_vm0, %v2687_v57 }
  0xa8   : > { %2426 = vmatprep.mubr.msk.bf16.mxu0 %vm409_vm0, %v2686_v58  ;;  %v3260_v21 = vpop.permute.xlu1 %1515 }
  0xa9   : > { %v3252_v17 = vpop.permute.xlu0 %1510 }
  0xac   : > { %v3268_v25 = vpop.permute.xlu1 %1525 }
  0xad   : > { %v3264_v23 = vpop.permute.xlu0 %1520 }
  0xae   : > { %2443 = vmatmul.mubr.msk.bf16.gmra.mrb[40].mxu1 %vm409_vm0, %v2689_v59 }
  0xaf   : > { %2427 = vmatmul.mubr.msk.bf16.gmra.mrb[8].mxu0 %vm409_vm0, %v2688_v60  ;;  %2446 = vmatprep.mubr.msk.bf16.mxu1 %vm409_vm0, %v2691_v61 }
  0xb0   : > { %2430 = vmatprep.mubr.msk.bf16.mxu0 %vm409_vm0, %v2690_v62  ;;  %v3278_v30 = vpop.permute.xlu1 %1535 }
  0xb1   : > { %v3272_v27 = vpop.permute.xlu0 %1530  ;;  %3517 = vst [vmem:[#allocation6_spill] sm:$0xff] %v3278_v30 }
  0xb2   : > { %3514 = vst [vmem:[#allocation3_spill] sm:$0xff] %v3272_v27 }
  0xb4   : > { %v3284_v44 = vpop.permute.xlu1 %1545 }
  0xb5   : > { %v3280_v31 = vpop.permute.xlu0 %1540  ;;  %3518 = vst [vmem:[#allocation7_spill] sm:$0xff] %v3284_v44 }
  0xb6   : > { %2447 = vmatmul.mubr.msk.bf16.gmra.mrb[44].mxu1 %vm409_vm0, %v2693_v63 }
  0xb7   : > { %2431 = vmatmul.mubr.msk.bf16.gmra.mrb[12].mxu0 %vm409_vm0, %v2692_v0 }
  0xb8   : > { %v3294_v58 = vpop.permute.xlu1 %1555 }
  0xb9   : > { %v1551_v45 = vpop.permute.xlu0 %1550 }
  0xbd   : > { %v1561_v59 = vpop.permute.xlu0 %1560 }
 0x131   : > { %v3226_v4 = vpop.f32.mrb[0].mxu1 }
 0x132   : > { %v3230_v6 = vpop.f32.mrb[1].mxu1 }
 0x133   : > { %v3234_v8 = vpop.f32.mrb[2].mxu1 }
 0x134   : > { %v3236_v9 = vpop.f32.mrb[3].mxu1 }
 0x139   : > { %v3242_v12 = vpop.f32.mrb[4].mxu1 }
 0x13a   : > { %v3244_v13 = vpop.f32.mrb[5].mxu1 }
 0x13b   : > { %v3246_v14 = vpop.f32.mrb[6].mxu1 }
 0x13c   : > { %v3248_v15 = vpop.f32.mrb[7].mxu1 }
 0x141   : > { %v3254_v18 = vpop.f32.mrb[8].mxu1 }
 0x142   : > { %v3256_v19 = vpop.f32.mrb[9].mxu1 }
 0x143   : > { %v3258_v20 = vpop.f32.mrb[10].mxu1 }
 0x144   : > { %v3262_v22 = vpop.f32.mrb[11].mxu1 }
 0x149   : > { %v3266_v24 = vpop.f32.mrb[12].mxu1 }
 0x14a   : > { %v3270_v26 = vpop.f32.mrb[13].mxu1 }
 0x14b   : > { %v3274_v28 = vpop.f32.mrb[14].mxu1 }
 0x14c   : > { %3515 = vst [vmem:[#allocation4_spill] sm:$0xff] %v3274_v28  ;;  %v3276_v29 = vpop.f32.mrb[15].mxu1 }
 0x14d   : > { %3516 = vst [vmem:[#allocation5_spill] sm:$0xff] %v3276_v29 }
 0x151   : > { %v2340_v32 = vpop.f32.mrb[16].mxu1 }
 0x152   : > { %v2388_v33 = vpop.f32.mrb[16].mxu0  ;;  %v580_v34 = vpop.f32.mrb[17].mxu1 }
 0x153   : > { %v942_v35 = vadd.f32 %v2388_v33, %v2340_v32  ;;  %v933_v36 = vpop.f32.mrb[17].mxu0  ;;  %v2341_v37 = vpop.f32.mrb[18].mxu1 }
 0x154   : > { %v934_v38 = vadd.f32 %v933_v36, %v580_v34  ;;  %v2389_v39 = vpop.f32.mrb[18].mxu0  ;;  %v583_v40 = vpop.f32.mrb[19].mxu1 }
 0x155   : > { %v945_v41 = vadd.f32 %v2389_v39, %v2341_v37  ;;  %v936_v42 = vpop.f32.mrb[19].mxu0 }
 0x156   : > { %v3282_v43 = vadd.f32 %v936_v42, %v583_v40  ;;  %v1566_v42 = vpop.permute.xlu1 %1565 }
 0x159   : > { %v2344_v46 = vpop.f32.mrb[20].mxu1 }
 0x15a   : > { %v2392_v47 = vpop.f32.mrb[20].mxu0  ;;  %v596_v48 = vpop.f32.mrb[21].mxu1 }
 0x15b   : > { %v3286_v49 = vadd.f32 %v2392_v47, %v2344_v46  ;;  %v949_v50 = vpop.f32.mrb[21].mxu0  ;;  %v2345_v51 = vpop.f32.mrb[22].mxu1 }
 0x15c   : > { %v3288_v52 = vadd.f32 %v949_v50, %v596_v48  ;;  %v2393_v53 = vpop.f32.mrb[22].mxu0  ;;  %v599_v54 = vpop.f32.mrb[23].mxu1 }
 0x15d   : > { %v3290_v55 = vadd.f32 %v2393_v53, %v2345_v51  ;;  %v952_v56 = vpop.f32.mrb[23].mxu0  ;;  %v3304_v46 = vpop.permute.xlu0 %1570 }
 0x15e   : > { %v3292_v57 = vadd.f32 %v952_v56, %v599_v54 }
 0x161   : > { %v2348_v60 = vpop.f32.mrb[24].mxu1 }
 0x162   : > { %v2396_v61 = vpop.f32.mrb[24].mxu0  ;;  %v612_v62 = vpop.f32.mrb[25].mxu1 }
 0x163   : > { %v3296_v63 = vadd.f32 %v2396_v61, %v2348_v60  ;;  %v965_v0 = vpop.f32.mrb[25].mxu0  ;;  %v2349_v32 = vpop.f32.mrb[26].mxu1 }
 0x164   : > { %v3298_v33 = vadd.f32 %v965_v0, %v612_v62  ;;  %v2397_v34 = vpop.f32.mrb[26].mxu0  ;;  %v615_v36 = vpop.f32.mrb[27].mxu1 }
 0x165   : > { %v3300_v37 = vadd.f32 %v2397_v34, %v2349_v32  ;;  %v968_v39 = vpop.f32.mrb[27].mxu0  ;;  %v3314_v34 = vpop.permute.xlu1 %1575 }
 0x166   : > { %v3302_v40 = vadd.f32 %v968_v39, %v615_v36  ;;  %v3317_v36 = vpop.permute.xlu0 %1580 }
 0x169   : > { %v2352_v47 = vpop.f32.mrb[28].mxu1 }
 0x16a   : > { %v2400_v48 = vpop.f32.mrb[28].mxu0  ;;  %v628_v50 = vpop.f32.mrb[29].mxu1 }
 0x16b   : > { %v3306_v51 = vadd.f32 %v2400_v48, %v2352_v47  ;;  %v981_v53 = vpop.f32.mrb[29].mxu0  ;;  %v2353_v54 = vpop.f32.mrb[30].mxu1 }
 0x16c   : > { %v3308_v56 = vadd.f32 %v981_v53, %v628_v50  ;;  %v2401_v60 = vpop.f32.mrb[30].mxu0  ;;  %v631_v61 = vpop.f32.mrb[31].mxu1 }
 0x16d   : > { %v3310_v62 = vadd.f32 %v2401_v60, %v2353_v54  ;;  %v984_v0 = vpop.f32.mrb[31].mxu0 }
 0x16e   : > { %3519 = vst [vmem:[#allocation8_spill] sm:$0xff] %v3308_v56  ;;  %v3312_v32 = vadd.f32 %v984_v0, %v631_v61 }
 0x16f   : > { %3520 = vst [vmem:[#allocation9_spill] sm:$0xff] %v3310_v62 }
 0x170   : > { %3521 = vst [vmem:[#allocation10_spill] sm:$0xff] %v3312_v32 }
 0x171   : > { %v2436_v39 = vpop.f32.mrb[32].mxu1 }
 0x172   : > { %v2420_v30 = vpop.f32.mrb[0].mxu0  ;;  %v1422_v47 = vadd.f32 %v2436_v39, %v942_v35  ;;  %v1341_v48 = vpop.f32.mrb[33].mxu1 }
 0x173   : > { %v2466_v50 = vadd.f32 %v2420_v30, %v3226_v4  ;;  %v1277_v53 = vpop.f32.mrb[1].mxu0  ;;  %v1420_v29 = vadd.f32 %v1341_v48, %v934_v38  ;;  %v2437_v44 = vpop.f32.mrb[34].mxu1 }
 0x174   : > { %v1646_v54 = vadd.f32 %v1561_v59, %v1422_v47  ;;  %v2467_v60 = vadd.f32 %v1277_v53, %v3230_v6  ;;  %v2421_v61 = vpop.f32.mrb[2].mxu0  ;;  %v1423_v0 = vadd.f32 %v2437_v44, %v945_v41  ;;  %v1344_v32 = vpop.f32.mrb[35].mxu1 }
 0x175   : > { %v1630_v62 = vadd.f32 %v2466_v50, %v3222_v2  ;;  %v1644_v27 = vadd.f32 %v1551_v45, %v1420_v29  ;;  %v2468_v28 = vadd.f32 %v2421_v61, %v3234_v8  ;;  %v1280_v56 = vpop.f32.mrb[3].mxu0  ;;  %v1421_v35 = vadd.f32 %v1344_v32, %v3282_v43  ;;  %v3325_v59 = vpop.permute.xlu1 %1585 }
 0x176   : > { %vm1678_vm1 = vcmp.gt.f32.partialorder %v1646_v54, 0.0  ;;  %v1710_v39 = vmul.f32 0.01, %v1646_v54  ;;  %v1628_v4 = vadd.f32 %v2467_v60, %v3220_v1  ;;  %v1647_v30 = vadd.f32 %v1566_v42, %v1423_v0  ;;  %v3328_v8 = vpop.permute.xlu0 %1590 }
 0x177   : > { %vm1662_vm2 = vcmp.gt.f32.partialorder %v1630_v62, 0.0  ;;  %v1694_v38 = vmul.f32 0.01, %v1630_v62  ;;  %vm1676_vm3 = vcmp.gt.f32.partialorder %v1644_v27, 0.0  ;;  %v1708_v6 = vmul.f32 0.01, %v1644_v27 }
 0x178   : > { %v1742_v41 = vsel %vm1678_vm1, %v1646_v54, %v1710_v39  ;;  %vm1660_vm4 = vcmp.gt.f32.partialorder %v1628_v4, 0.0  ;;  %v1692_v2 = vmul.f32 0.01, %v1628_v4  ;;  %v1631_v29 = vadd.f32 %v2468_v28, %v3228_v5 }
 0x179   : > { %v1726_v44 = vsel %vm1662_vm2, %v1630_v62, %v1694_v38  ;;  %1774 = vst [vmem:[%s3330_s12 + $0x90] sm:$0xff] %v1742_v41  ;;  %v1740_v1 = vsel %vm1676_vm3, %v1644_v27, %v1708_v6  ;;  %vm1679_vm5 = vcmp.gt.f32.partialorder %v1647_v30, 0.0  ;;  %v1711_v43 = vmul.f32 0.01, %v1647_v30  ;;  %v2440_v45 = vpop.f32.mrb[36].mxu1  ;;  %v3349_v38 = vpop.permute.xlu1 %1595 }
 0x17a   : > { %1758 = vst [vmem:[%s3330_s12 + $0x10] sm:$0xff] %v1726_v44  ;;  %v1724_v42 = vsel %vm1660_vm4, %v1628_v4, %v1692_v2  ;;  %1772 = vst [vmem:[%s3330_s12 + $0x80] sm:$0xff] %v1740_v1  ;;  %vm1663_vm6 = vcmp.gt.f32.partialorder %v1631_v29, 0.0  ;;  %v1695_v5 = vmul.f32 0.01, %v1631_v29  ;;  %v2469_v28 = vadd.f32 %v1280_v56, %v3236_v9  ;;  %v2424_v62 = vpop.f32.mrb[4].mxu0  ;;  %v1601_v41 = vpop.permute.xlu0 %1600 }
 0x17b   : > { %v1357_v32 = vpop.f32.mrb[37].mxu1  ;;  %1756 = vst [vmem:[%s3330_s12] sm:$0xff] %v1724_v42  ;;  %v1743_v47 = vsel %vm1679_vm5, %v1647_v30, %v1711_v43  ;;  %v1645_v48 = vadd.f32 %v3294_v58, %v1421_v35  ;;  %v2470_v27 = vadd.f32 %v2424_v62, %v3242_v12  ;;  %v1426_v50 = vadd.f32 %v2440_v45, %v3286_v49  ;;  %v1293_v53 = vpop.f32.mrb[5].mxu0 }
 0x17c   : > { %v2441_v54 = vpop.f32.mrb[38].mxu1  ;;  %v1727_v60 = vsel %vm1663_vm6, %v1631_v29, %v1695_v5  ;;  %1775 = vst [vmem:[%s3330_s12 + $0x98] sm:$0xff] %v1743_v47  ;;  %v1629_v61 = vadd.f32 %v2469_v28, %v3224_v3  ;;  %v2471_v0 = vadd.f32 %v1293_v53, %v3244_v13  ;;  %v1424_v9 = vadd.f32 %v1357_v32, %v3288_v52  ;;  %v2425_v56 = vpop.f32.mrb[6].mxu0 }
 0x17d   : > { %v1360_v39 = vpop.f32.mrb[39].mxu1  ;;  %1759 = vst [vmem:[%s3330_s12 + $0x18] sm:$0xff] %v1727_v60  ;;  %vm1677_vm7 = vcmp.gt.f32.partialorder %v1645_v48, 0.0  ;;  %v1709_v58 = vmul.f32 0.01, %v1645_v48  ;;  %v1634_v12 = vadd.f32 %v2470_v27, %v3240_v11  ;;  %v1650_v49 = vadd.f32 %v3317_v36, %v1426_v50  ;;  %v1296_v35 = vpop.f32.mrb[7].mxu0 }
 0x17e   : > { %vm1661_vm8 = vcmp.gt.f32.partialorder %v1629_v61, 0.0  ;;  %v1693_v4 = vmul.f32 0.01, %v1629_v61  ;;  %v1632_v3 = vadd.f32 %v2471_v0, %v3232_v7  ;;  %v1648_v13 = vadd.f32 %v3304_v46, %v1424_v9 }
 0x17f   : > { %v1741_v30 = vsel %vm1677_vm7, %v1645_v48, %v1709_v58  ;;  %vm1666_vm9 = vcmp.gt.f32.partialorder %v1634_v12, 0.0  ;;  %v1698_v52 = vmul.f32 0.01, %v1634_v12  ;;  %vm1682_vm10 = vcmp.gt.f32.partialorder %v1650_v49, 0.0 }
 0x180   : > { %v1725_v6 = vsel %vm1661_vm8, %v1629_v61, %v1693_v4  ;;  %1773 = vst [vmem:[%s3330_s12 + $0x88] sm:$0xff] %v1741_v30  ;;  %v1714_v11 = vmul.f32 0.01, %v1650_v49  ;;  %vm1664_vm11 = vcmp.gt.f32.partialorder %v1632_v3, 0.0  ;;  %v1696_v36 = vmul.f32 0.01, %v1632_v3 }
 0x181   : > { %1757 = vst [vmem:[%s3330_s12 + $0x8] sm:$0xff] %v1725_v6  ;;  %v1730_v2 = vsel %vm1666_vm9, %v1634_v12, %v1698_v52  ;;  %vm1680_vm12 = vcmp.gt.f32.partialorder %v1648_v13, 0.0  ;;  %v1712_v7 = vmul.f32 0.01, %v1648_v13  ;;  %v2472_v46 = vadd.f32 %v2425_v56, %v3246_v14  ;;  %v2444_v29 = vpop.f32.mrb[40].mxu1 }
 0x182   : > { %1762 = vst [vmem:[%s3330_s12 + $0x30] sm:$0xff] %v1730_v2  ;;  %v1746_v44 = vsel %vm1682_vm10, %v1650_v49, %v1714_v11  ;;  %v1728_v1 = vsel %vm1664_vm11, %v1632_v3, %v1696_v36  ;;  %v1427_v43 = vadd.f32 %v2441_v54, %v3290_v55  ;;  %v2473_v45 = vadd.f32 %v1296_v35, %v3248_v15  ;;  %v2428_v42 = vpop.f32.mrb[8].mxu0  ;;  %v1373_v5 = vpop.f32.mrb[41].mxu1 }
 0x183   : > { %1778 = vst [vmem:[%s3330_s12 + $0xb0] sm:$0xff] %v1746_v44  ;;  %1760 = vst [vmem:[%s3330_s12 + $0x20] sm:$0xff] %v1728_v1  ;;  %v1744_v28 = vsel %vm1680_vm12, %v1648_v13, %v1712_v7  ;;  %v1635_v62 = vadd.f32 %v2472_v46, %v3250_v16  ;;  %v1425_v32 = vadd.f32 %v1360_v39, %v3292_v57  ;;  %v1309_v47 = vpop.f32.mrb[9].mxu0  ;;  %v2445_v48 = vpop.f32.mrb[42].mxu1 }
 0x184   : > { %v2474_v14 = vadd.f32 %v2428_v42, %v3254_v18  ;;  %1776 = vst [vmem:[%s3330_s12 + $0xa0] sm:$0xff] %v1744_v28  ;;  %v1651_v27 = vadd.f32 %v3325_v59, %v1427_v43  ;;  %v1633_v55 = vadd.f32 %v2473_v45, %v3238_v10  ;;  %v1430_v15 = vadd.f32 %v2444_v29, %v3296_v63  ;;  %v2429_v53 = vpop.f32.mrb[10].mxu0  ;;  %v1376_v54 = vpop.f32.mrb[43].mxu1 }
 0x185   : > { %v2475_v50 = vadd.f32 %v1309_v47, %v3256_v19  ;;  %vm1667_vm13 = vcmp.gt.f32.partialorder %v1635_v62, 0.0  ;;  %v1699_v16 = vmul.f32 0.01, %v1635_v62  ;;  %v1649_v57 = vadd.f32 %v3314_v34, %v1425_v32  ;;  %v1312_v60 = vpop.f32.mrb[11].mxu0  ;;  %v1606_v19 = vpop.permute.xlu1 %1605 }
 0x186   : > { %v1638_v18 = vadd.f32 %v2474_v14, %v3264_v23  ;;  %vm1683_vm14 = vcmp.gt.f32.partialorder %v1651_v27, 0.0  ;;  %v1715_v59 = vmul.f32 0.01, %v1651_v27  ;;  %vm1665_vm15 = vcmp.gt.f32.partialorder %v1633_v55, 0.0  ;;  %v3370_v23 = vpop.permute.xlu0 %1610 }
 0x187   : > { %v1697_v10 = vmul.f32 0.01, %v1633_v55  ;;  %v1731_v61 = vsel %vm1667_vm13, %v1635_v62, %v1699_v16  ;;  %vm1681_vm0 = vcmp.gt.f32.partialorder %v1649_v57, 0.0  ;;  %v1713_v63 = vmul.f32 0.01, %v1649_v57  ;;  %v3524_v16 = vld [vmem:[#allocation3_spill] sm:$0xff] }
 0x188   : > { %vm1670_vm1 = vcmp.gt.f32.partialorder %v1638_v18, 0.0  ;;  %1763 = vst [vmem:[%s3330_s12 + $0x38] sm:$0xff] %v1731_v61  ;;  %v1747_v0 = vsel %vm1683_vm14, %v1651_v27, %v1715_v59  ;;  %v1702_v56 = vmul.f32 0.01, %v1638_v18  ;;  %v1654_v34 = vadd.f32 %v1601_v41, %v1430_v15  ;;  %v3526_v59 = vld [vmem:[#allocation9_spill] sm:$0xff] }
 0x189   : > { %v1729_v9 = vsel %vm1665_vm15, %v1633_v55, %v1697_v10  ;;  %1779 = vst [vmem:[%s3330_s12 + $0xb8] sm:$0xff] %v1747_v0  ;;  %v1745_v39 = vsel %vm1681_vm0, %v1649_v57, %v1713_v63  ;;  %v1636_v58 = vadd.f32 %v2475_v50, %v3252_v17  ;;  %v1428_v12 = vadd.f32 %v1373_v5, %v3298_v33  ;;  %v2448_v35 = vpop.f32.mrb[44].mxu1  ;;  %v1616_v5 = vpop.permute.xlu1 %1615  ;;  %v3523_v55 = vld [vmem:[#allocation4_spill] sm:$0xff]  ;;  %v3527_v61 = vld [vmem:[#allocation5_spill] sm:$0xff] }
 0x18a   : > { %1761 = vst [vmem:[%s3330_s12 + $0x28] sm:$0xff] %v1729_v9  ;;  %v2476_v49 = vadd.f32 %v2429_v53, %v3258_v20  ;;  %1777 = vst [vmem:[%s3330_s12 + $0xa8] sm:$0xff] %v1745_v39  ;;  %v1734_v4 = vsel %vm1670_vm1, %v1638_v18, %v1702_v56  ;;  %vm1686_vm2 = vcmp.gt.f32.partialorder %v1654_v34, 0.0  ;;  %v1718_v3 = vmul.f32 0.01, %v1654_v34  ;;  %v2432_v30 = vpop.f32.mrb[12].mxu0  ;;  %v1621_v28 = vpop.permute.xlu0 %1620 }
 0x18b   : > { %v1431_v13 = vadd.f32 %v2445_v48, %v3300_v37  ;;  %v1389_v52 = vpop.f32.mrb[45].mxu1  ;;  %1766 = vst [vmem:[%s3330_s12 + $0x50] sm:$0xff] %v1734_v4  ;;  %vm1668_vm3 = vcmp.gt.f32.partialorder %v1636_v58, 0.0  ;;  %v1700_v6 = vmul.f32 0.01, %v1636_v58  ;;  %v1652_v17 = vadd.f32 %v3328_v8, %v1428_v12  ;;  %v1325_v20 = vpop.f32.mrb[13].mxu0 }
 0x18c   : > { %v1639_v33 = vadd.f32 %v2476_v49, %v3268_v25  ;;  %v2449_v11 = vpop.f32.mrb[46].mxu1  ;;  %v1750_v36 = vsel %vm1686_vm2, %v1654_v34, %v1718_v3  ;;  %v2477_v2 = vadd.f32 %v1312_v60, %v3262_v22  ;;  %v1429_v7 = vadd.f32 %v1376_v54, %v3302_v40  ;;  %v2433_v37 = vpop.f32.mrb[14].mxu0  ;;  %v3525_v18 = vld [vmem:[#allocation7_spill] sm:$0xff]  ;;  %v3529_v49 = vld [vmem:[#allocation6_spill] sm:$0xff] }
 0x18d   : > { %v1655_v41 = vadd.f32 %v1606_v19, %v1431_v13  ;;  %v1392_v46 = vpop.f32.mrb[47].mxu1  ;;  %1782 = vst [vmem:[%s3330_s12 + $0xd0] sm:$0xff] %v1750_v36  ;;  %v1732_v29 = vsel %vm1668_vm3, %v1636_v58, %v1700_v6  ;;  %vm1684_vm4 = vcmp.gt.f32.partialorder %v1652_v17, 0.0  ;;  %v1716_v44 = vmul.f32 0.01, %v1652_v17  ;;  %v1328_v8 = vpop.f32.mrb[15].mxu0 }
 0x18e   : > { %vm1671_vm5 = vcmp.gt.f32.partialorder %v1639_v33, 0.0  ;;  %1764 = vst [vmem:[%s3330_s12 + $0x40] sm:$0xff] %v1732_v29  ;;  %v1703_v25 = vmul.f32 0.01, %v1639_v33  ;;  %v1637_v43 = vadd.f32 %v2477_v2, %v3260_v21  ;;  %v1653_v40 = vadd.f32 %v3349_v38, %v1429_v7  ;;  %v3528_v19 = vld [vmem:[#allocation10_spill] sm:$0xff]  ;;  %v1626_v9 = vpop.permute.xlu1 %1625  ;;  %v1890_v36 = vld [vmem:[%s3330_s12 + $0x8] sm:$0xff] (%p2817_p5) }
 0x18f   : > { %vm1687_vm6 = vcmp.gt.f32.partialorder %v1655_v41, 0.0  ;;  %v1719_v1 = vmul.f32 0.01, %v1655_v41  ;;  %v1748_v22 = vsel %vm1684_vm4, %v1652_v17, %v1716_v44  ;;  %v2478_v45 = vadd.f32 %v2432_v30, %v3266_v24  ;;  %v1894_v2 = vld [vmem:[%s3330_s12 + $0x18] sm:$0xff] (%p2817_p5)  ;;  %v1896_v7 = vld [vmem:[%s3330_s12 + $0x20] sm:$0xff] (%p2817_p5)  ;;  %1891 = vst [vmem:[%s3431_s28 + $0x10] sm:$0xff] (%p2817_p5), %v1890_v36 }
 0x190   : > { %v1434_v42 = vadd.f32 %v2448_v35, %v3306_v51  ;;  %1780 = vst [vmem:[%s3330_s12 + $0xc0] sm:$0xff] %v1748_v22  ;;  %v1735_v62 = vsel %vm1671_vm5, %v1639_v33, %v1703_v25  ;;  %vm1669_vm7 = vcmp.gt.f32.partialorder %v1637_v43, 0.0  ;;  %v1701_v14 = vmul.f32 0.01, %v1637_v43  ;;  %v3522_v51 = vld [vmem:[#allocation8_spill] sm:$0xff]  ;;  %v1902_v29 = vld [vmem:[%s3330_s12 + $0x38] sm:$0xff] (%p2817_p5) }
 0x191   : > { %v1751_v32 = vsel %vm1687_vm6, %v1655_v41, %v1719_v1  ;;  %1767 = vst [vmem:[%s3330_s12 + $0x58] sm:$0xff] %v1735_v62  ;;  %vm1685_vm8 = vcmp.gt.f32.partialorder %v1653_v40, 0.0  ;;  %v1717_v21 = vmul.f32 0.01, %v1653_v40  ;;  %v1642_v47 = vadd.f32 %v2478_v45, %v3280_v31  ;;  %v1892_v41 = vld [vmem:[%s3330_s12 + $0x10] sm:$0xff] (%p2817_p5)  ;;  %1895 = vst [vmem:[%s3431_s28 + $0x30] sm:$0xff] (%p2817_p5), %v1894_v2 }
 0x192   : > { %1783 = vst [vmem:[%s3330_s12 + $0xd8] sm:$0xff] %v1751_v32  ;;  %v1658_v38 = vadd.f32 %v1621_v28, %v1434_v42  ;;  %v1733_v48 = vsel %vm1669_vm7, %v1637_v43, %v1701_v14  ;;  %v2479_v24 = vadd.f32 %v1325_v20, %v3270_v26  ;;  %v1432_v27 = vadd.f32 %v1389_v52, %v3522_v51  ;;  %v1908_v25 = vld [vmem:[%s3330_s12 + $0x50] sm:$0xff] (%p2817_p5)  ;;  %v1920_v42 = vld [vmem:[%s3330_s12 + $0x80] sm:$0xff] (%p2817_p5)  ;;  %v1926_v62 = vld [vmem:[%s3330_s12 + $0x98] sm:$0xff] (%p2817_p5) }
 0x193   : > { %v2480_v15 = vadd.f32 %v2433_v37, %v3523_v55  ;;  %1765 = vst [vmem:[%s3330_s12 + $0x48] sm:$0xff] %v1733_v48  ;;  %v1749_v50 = vsel %vm1685_vm8, %v1653_v40, %v1717_v21  ;;  %vm1674_vm9 = vcmp.gt.f32.partialorder %v1642_v47, 0.0  ;;  %v1706_v53 = vmul.f32 0.01, %v1642_v47  ;;  %v1898_v37 = vld [vmem:[%s3330_s12 + $0x28] sm:$0xff] (%p2817_p5)  ;;  %1893 = vst [vmem:[%s3431_s28 + $0x20] sm:$0xff] (%p2817_p5), %v1892_v41 }
 0x194   : > { %vm1690_vm10 = vcmp.gt.f32.partialorder %v1658_v38, 0.0  ;;  %1781 = vst [vmem:[%s3330_s12 + $0xc8] sm:$0xff] %v1749_v50  ;;  %v1722_v54 = vmul.f32 0.01, %v1658_v38  ;;  %v1640_v57 = vadd.f32 %v2479_v24, %v3524_v16  ;;  %v1656_v31 = vadd.f32 %v3370_v23, %v1432_v27  ;;  %1897 = vst [vmem:[%s3431_s28 + $0x40] sm:$0xff] (%p2817_p5), %v1896_v7  ;;  %v1924_v28 = vld [vmem:[%s3330_s12 + $0x90] sm:$0xff] (%p2817_p5) }
 0x195   : > { %v1643_v60 = vadd.f32 %v2480_v15, %v3525_v18  ;;  %v1738_v26 = vsel %vm1674_vm9, %v1642_v47, %v1706_v53  ;;  %v1435_v10 = vadd.f32 %v2449_v11, %v3526_v59  ;;  %v2481_v63 = vadd.f32 %v1328_v8, %v3527_v61  ;;  %v1888_v11 = vld [vmem:[%s3330_s12] sm:$0xff] (%p2817_p5)  ;;  %1899 = vst [vmem:[%s3431_s28 + $0x50] sm:$0xff] (%p2817_p5), %v1898_v37  ;;  %v1930_v14 = vld [vmem:[%s3330_s12 + $0xa8] sm:$0xff] (%p2817_p5)  ;;  %v1932_v21 = vld [vmem:[%s3330_s12 + $0xb0] sm:$0xff] (%p2817_p5) }
 0x196   : > { %v1433_v0 = vadd.f32 %v1392_v46, %v3528_v19  ;;  %1770 = vst [vmem:[%s3330_s12 + $0x70] sm:$0xff] %v1738_v26  ;;  %v1754_v56 = vsel %vm1690_vm10, %v1658_v38, %v1722_v54  ;;  %vm1672_vm11 = vcmp.gt.f32.partialorder %v1640_v57, 0.0  ;;  %v1704_v34 = vmul.f32 0.01, %v1640_v57  ;;  %v1900_v46 = vld [vmem:[%s3330_s12 + $0x30] sm:$0xff] (%p2817_p5)  ;;  %v1904_v44 = vld [vmem:[%s3330_s12 + $0x40] sm:$0xff] (%p2817_p5)  ;;  %1889 = vst [vmem:[%s3431_s28] sm:$0xff] (%p2817_p5), %v1888_v11 }
 0x197   : > { %vm1688_vm12 = vcmp.gt.f32.partialorder %v1656_v31, 0.0  ;;  %1786 = vst [vmem:[%s3330_s12 + $0xf0] sm:$0xff] %v1754_v56  ;;  %v1720_v23 = vmul.f32 0.01, %v1656_v31  ;;  %vm1675_vm13 = vcmp.gt.f32.partialorder %v1643_v60, 0.0  ;;  %v1659_v58 = vadd.f32 %v1626_v9, %v1435_v10  ;;  %1901 = vst [vmem:[%s3431_s28 + $0x60] sm:$0xff] (%p2817_p5), %v1900_v46 }
 0x198   : > { %v1707_v39 = vmul.f32 0.01, %v1643_v60  ;;  %v1736_v12 = vsel %vm1672_vm11, %v1640_v57, %v1704_v34  ;;  %v1641_v35 = vadd.f32 %v2481_v63, %v3529_v49  ;;  %v1657_v4 = vadd.f32 %v1616_v5, %v1433_v0  ;;  %1794 = sbr.rel (!%p2817_p5) target bundleno = 424 (0x1a8), region = 36  ;;  %v1910_v1 = vld [vmem:[%s3330_s12 + $0x58] sm:$0xff] (%p2817_p5)  ;;  %1903 = vst [vmem:[%s3431_s28 + $0x70] sm:$0xff] (%p2817_p5), %v1902_v29  ;;  %1905 = vst [vmem:[%s3431_s28 + $0x80] sm:$0xff] (%p2817_p5), %v1904_v44 }
 0x199   : > { %1768 = vst [vmem:[%s3330_s12 + $0x60] sm:$0xff] %v1736_v12  ;;  %v1752_v3 = vsel %vm1688_vm12, %v1656_v31, %v1720_v23  ;;  %vm1691_vm14 = vcmp.gt.f32.partialorder %v1659_v58, 0.0  ;;  %v1723_v30 = vmul.f32 0.01, %v1659_v58  ;;  %1909 = vst [vmem:[%s3431_s28 + $0xa0] sm:$0xff] (%p2817_p5), %v1908_v25  ;;  %v1922_v5 = vld [vmem:[%s3330_s12 + $0x88] sm:$0xff] (%p2817_p5) }
 0x19a   : > { %v1739_v13 = vsel %vm1675_vm13, %v1643_v60, %v1707_v39  ;;  %1784 = vst [vmem:[%s3330_s12 + $0xe0] sm:$0xff] %v1752_v3  ;;  %vm1673_vm15 = vcmp.gt.f32.partialorder %v1641_v35, 0.0  ;;  %v1705_v52 = vmul.f32 0.01, %v1641_v35  ;;  %vm1689_vm0 = vcmp.gt.f32.partialorder %v1657_v4, 0.0  ;;  %v1906_v8 = vld [vmem:[%s3330_s12 + $0x48] sm:$0xff] (%p2817_p5) }
 0x19b   : > { %1771 = vst [vmem:[%s3330_s12 + $0x78] sm:$0xff] %v1739_v13  ;;  %v1721_v6 = vmul.f32 0.01, %v1657_v4  ;;  %v1755_v17 = vsel %vm1691_vm14, %v1659_v58, %v1723_v30  ;;  %1907 = vst [vmem:[%s3431_s28 + $0x90] sm:$0xff] (%p2817_p5), %v1906_v8  ;;  %v1928_v32 = vld [vmem:[%s3330_s12 + $0xa0] sm:$0xff] (%p2817_p5)  ;;  %v1934_v47 = vld [vmem:[%s3330_s12 + $0xb8] sm:$0xff] (%p2817_p5) }
 0x19c   : > { %1787 = vst [vmem:[%s3330_s12 + $0xf8] sm:$0xff] %v1755_v17  ;;  %v1737_v33 = vsel %vm1673_vm15, %v1641_v35, %v1705_v52  ;;  %1911 = vst [vmem:[%s3431_s28 + $0xb0] sm:$0xff] (%p2817_p5), %v1910_v1  ;;  %v1936_v38 = vld [vmem:[%s3330_s12 + $0xc0] sm:$0xff] (%p2817_p5)  ;;  %v1938_v48 = vld [vmem:[%s3330_s12 + $0xc8] sm:$0xff] (%p2817_p5) }
 0x19d   : > { %v1753_v20 = vsel %vm1689_vm0, %v1657_v4, %v1721_v6  ;;  %1769 = vst [vmem:[%s3330_s12 + $0x68] sm:$0xff] %v1737_v33  ;;  %v1916_v40 = vld [vmem:[%s3330_s12 + $0x70] sm:$0xff] (%p2817_p5)  ;;  %1921 = vst [vmem:[%s3431_s28 + $0x100] sm:$0xff] (%p2817_p5), %v1920_v42  ;;  %v1942_v51 = vld [vmem:[%s3330_s12 + $0xd8] sm:$0xff] (%p2817_p5) }
 0x19e   : > { %1785 = vst [vmem:[%s3330_s12 + $0xe8] sm:$0xff] %v1753_v20  ;;  %1917 = vst [vmem:[%s3431_s28 + $0xe0] sm:$0xff] (%p2817_p5), %v1916_v40  ;;  %v1940_v24 = vld [vmem:[%s3330_s12 + $0xd0] sm:$0xff] (%p2817_p5) }
 0x19f   : > { %1923 = vst [vmem:[%s3431_s28 + $0x110] sm:$0xff] %v1922_v5  ;;  %1925 = vst [vmem:[%s3431_s28 + $0x120] sm:$0xff] %v1924_v28  ;;  %v1948_v15 = vld [vmem:[%s3330_s12 + $0xf0] sm:$0xff] }
 0x1a0   : > { %v1912_v43 = vld [vmem:[%s3330_s12 + $0x60] sm:$0xff]  ;;  %1927 = vst [vmem:[%s3431_s28 + $0x130] sm:$0xff] %v1926_v62  ;;  %1929 = vst [vmem:[%s3431_s28 + $0x140] sm:$0xff] %v1928_v32 }
 0x1a1   : > { %1913 = vst [vmem:[%s3431_s28 + $0xc0] sm:$0xff] %v1912_v43  ;;  %1931 = vst [vmem:[%s3431_s28 + $0x150] sm:$0xff] %v1930_v14  ;;  %v1944_v27 = vld [vmem:[%s3330_s12 + $0xe0] sm:$0xff] }
 0x1a2   : > { %v1918_v45 = vld [vmem:[%s3330_s12 + $0x78] sm:$0xff]  ;;  %1933 = vst [vmem:[%s3431_s28 + $0x160] sm:$0xff] %v1932_v21  ;;  %1935 = vst [vmem:[%s3431_s28 + $0x170] sm:$0xff] %v1934_v47 }
 0x1a3   : > { %1919 = vst [vmem:[%s3431_s28 + $0xf0] sm:$0xff] %v1918_v45  ;;  %1937 = vst [vmem:[%s3431_s28 + $0x180] sm:$0xff] %v1936_v38  ;;  %v1950_v50 = vld [vmem:[%s3330_s12 + $0xf8] sm:$0xff] }
 0x1a4   : > { %v1914_v22 = vld [vmem:[%s3330_s12 + $0x68] sm:$0xff]  ;;  %1939 = vst [vmem:[%s3431_s28 + $0x190] sm:$0xff] %v1938_v48  ;;  %1941 = vst [vmem:[%s3431_s28 + $0x1a0] sm:$0xff] %v1940_v24 }
 0x1a5   : > { %1915 = vst [vmem:[%s3431_s28 + $0xd0] sm:$0xff] %v1914_v22  ;;  %v1946_v55 = vld [vmem:[%s3330_s12 + $0xe8] sm:$0xff]  ;;  %1943 = vst [vmem:[%s3431_s28 + $0x1b0] sm:$0xff] %v1942_v51 }
 0x1a6   : > { %1945 = vst [vmem:[%s3431_s28 + $0x1c0] sm:$0xff] %v1944_v27  ;;  %1947 = vst [vmem:[%s3431_s28 + $0x1d0] sm:$0xff] %v1946_v55 }
 0x1a7   : > { %1949 = vst [vmem:[%s3431_s28 + $0x1e0] sm:$0xff] %v1948_v15  ;;  %1951 = vst [vmem:[%s3431_s28 + $0x1f0] sm:$0xff] %v1950_v50 }
 0x1a8 PF: > { %s13_s18 = sadd.s32 1, %s2748_s18   ;;  %s3530_s12 = smov %s2728_s13 }
 0x1a9   : > { %p10_p10 = scmp.ge.s32.totalorder %s13_s18, 6   ;;  %s3531_s13 = smov %s2828_s27 }
 0x1aa   : > { %s3532_s14 = smov %s2740_s16  ;;  %s3533_s15 = smov %s2744_s17 }
 0x1ab   : > { %s3534_s16 = smov %s3537_s19  ;;  %s3535_s17 = smov %s3541_s20 }
 0x1ac   :  { %12 = sbr.rel (!%p10_p10) target bundleno = 4 (0x4), region = 105 }

</bundles_post_ra>
